<compile_context>
chip_gen: v5e
topology: v5e:2x2
jax: 0.10.0
libtpu: 0.0.40
codegen_flags: <defaults>
</compile_context>

<pallas_src>
import functools

import numpy as np
import jax
import jax.numpy as jnp
from jax.experimental import pallas as pl
from jax.experimental.pallas import tpu as pltpu


_BYTE_SHIFTS_CACHE = None


def _detect_byte_shifts():
    """Bit shift of channel byte c inside the bitcast 32-bit pixel word."""
    global _BYTE_SHIFTS_CACHE
    if _BYTE_SHIFTS_CACHE is not None:
        return _BYTE_SHIFTS_CACHE
    probe = jax.lax.bitcast_convert_type(
        jnp.array([0x01, 0x02, 0x03, 0x04], dtype=jnp.uint8), jnp.uint32)
    probe = int(jax.device_get(probe))
    if probe == 0x04030201:          # byte k -> bits [8k, 8k+8)
        shifts = (0, 8, 16, 24)
    elif probe == 0x01020304:        # byte k -> bits [8*(3-k), ...)
        shifts = (24, 16, 8, 0)
    else:
        raise ValueError(f"unexpected bitcast byte order: {probe:#x}")
    _BYTE_SHIFTS_CACHE = shifts
    return shifts


def _pack_frames_to_u32(video_u8):
    """(F, H, W, 4) uint8 -> ((F, H, W) uint32 pixel words, per-channel shifts)."""
    try:
        shifts = _detect_byte_shifts()
        packed = jax.lax.bitcast_convert_type(video_u8, jnp.uint32)
        return packed, shifts
    except Exception:
        # Fallback if width-changing bitcast is unavailable: arithmetic pack in
        # uint32 (no sign/overflow concerns), one extra XLA pass (fallback only).
        b = video_u8.astype(jnp.uint32)
        packed = (b[..., 0] | (b[..., 1] << 8) | (b[..., 2] << 16) | (b[..., 3] << 24))
        return packed, (0, 8, 16, 24)


def _pick_lane_dim(H, W):
    """Lane (last-dim) size of the flattened (n_rows, lane) pixel-plane view.

    Keeps the output lane-dense (multiple of 128) whenever H*W allows it so the
    kernel stores are unmasked `vst` rather than short/masked partials; W that
    is already a multiple of 128 is kept as-is, and if H*W has no 128-multiple
    divisor we fall back to W (block last dim == full array dim is legal)."""
    if W % 128 == 0:
        return W
    hw = H * W
    for lane in (1024, 896, 768, 640, 512, 384, 256, 128):
        if hw % lane == 0:
            return lane
    return W


def _round_up(x, m):
    return -(-x // m) * m


def _pick_row_tile(n_rows, lane, channels, n_t, target_bytes):
    """Rows per block so combined in+out block ~= target_bytes; rows % 32 == 0."""
    per_row = lane * (4 + channels)                  # uint32 in + C uint8 out
    rt = (max(target_bytes // per_row, 32) // 32) * 32
    if rt >= n_rows:
        rt = n_rows
        # v7x 2-TC balance: avoid odd tiny grids like (T odd, n_row_blocks == 1).
        if n_t % 2 == 1 and n_rows >= 64:
            half = min(_round_up(pl.cdiv(n_rows, 2), 32), n_rows)
            if half < n_rows:
                rt = half
        return rt
    n_blk = pl.cdiv(n_rows, rt)
    # v7x 2-TC balance: keep the row-block count even when T is odd.
    if n_t % 2 == 1 and n_blk % 2 == 1 and n_rows >= 64:
        rt2 = min(_round_up(pl.cdiv(n_rows, n_blk + 1), 32), n_rows)
        if 32 <= rt2 < n_rows and pl.cdiv(n_rows, rt2) % 2 == 0:
            rt = rt2
    return rt


@functools.partial(jax.jit, static_argnames=("channels", "shifts", "row_tile"))
def _gather_permute_nchw(packed_u32, frame_idx, *, channels, shifts, row_tile):
    """packed_u32: (F, n_rows, lane) uint32 pixel words; frame_idx: (T,) int32.

    Returns (T, channels, n_rows, lane) uint8 where out[t, c] holds channel c of
    frame frame_idx[t] in the flattened lane-dense layout — i.e. get_batch +
    permute(0, 3, 1, 2), up to a free row-major reshape back to (H, W).
    """
    _, n_rows, lane = packed_u32.shape
    T = frame_idx.shape[0]
    n_blk = pl.cdiv(n_rows, row_tile)

    def kernel(idx_ref, x_ref, o_ref):
        del idx_ref                        # only consumed by the index_maps
        word = x_ref[0]                    # (row_tile, lane) uint32, lane-dense
        for c in range(channels):          # static unroll (channels == 4)
            b = word if shifts[c] == 0 else (word >> shifts[c])   # logical shift
            o_ref[0, c] = b.astype(jnp.uint8)   # narrowing cast keeps the low byte

    in_block = row_tile * lane * 4
    out_block = channels * row_tile * lane
    # 2 pipeline buffers per operand + slack; explicit so the v5e 16 MiB default
    # and the v7x 64 MiB physical budget are both handled.
    vmem_limit = int(min(max(2 * (in_block + out_block) + (4 << 20), 32 << 20),
                         48 << 20))

    return pl.pallas_call(
        kernel,
        out_shape=jax.ShapeDtypeStruct((T, channels, n_rows, lane), jnp.uint8),
        grid_spec=pltpu.PrefetchScalarGridSpec(
            num_scalar_prefetch=1,
            grid=(T, n_blk),
            in_specs=[
                # Gather: the input DMA for grid step (t, r) reads frame frame_idx[t].
                # TODO(synk): on v7x, if xprof shows this gathered DMA exposed, add
                # pipeline_mode=pl.Buffered(3) here and re-check the VMEM budget.
                pl.BlockSpec((1, row_tile, lane), lambda t, r, idx: (idx[t], r, 0)),
            ],
            out_specs=pl.BlockSpec(
                (1, channels, row_tile, lane), lambda t, r, idx: (t, 0, r, 0)),
        ),
        compiler_params=pltpu.CompilerParams(
            dimension_semantics=("parallel", "parallel"),
            vmem_limit_bytes=vmem_limit),
        cost_estimate=pl.CostEstimate(
            flops=0, transcendentals=0,
            bytes_accessed=T * n_rows * lane * (4 + channels)),
    )(frame_idx, packed_u32)


def batch_decode_iter(decoded_frames_u8, batch_data_list, clip_len, misc_meta=None,
                      target_block_bytes=8 << 20):
    """Mirrors BatchDecodeIter.forward(...) + iteration over __next__.

    decoded_frames_u8: (num_frames, H, W, 4) uint8 — stands in for the
        decord.VideoReader frame source.
        # TODO(synk): the actual codec decode (vr.get_batch on encoded video) is
        # host-side I/O with no Pallas equivalent.
    batch_data_list: list of {"batch_id", "frame_indices", "num_clips"}.
    Yields dicts with "inputs" of shape (num_clips, clip_len, C, H, W) uint8
    and the meta bookkeeping of the original module.
    """
    misc_meta = dict(misc_meta or {})
    F, H, W, C = decoded_frames_u8.shape
    if C != 4:
        # TODO(synk): C=3 (plain RGB) needs a byte-gather path; only the 4-byte
        # packed-pixel kernel is implemented here.
        raise NotImplementedError("kernel implements the C == 4 packed-pixel path")
    if not batch_data_list:
        return

    packed, shifts = _pack_frames_to_u32(decoded_frames_u8)   # (F, H, W) uint32
    lane = _pick_lane_dim(H, W)
    n_rows = (H * W) // lane
    packed = packed.reshape(F, n_rows, lane)                  # lane-dense flat view

    # One jit/Mosaic signature for all batches: pad T up to the largest batch
    # (extra gathered rows are sliced off), avoiding a recompile per num_clips.
    t_bucket = clip_len * max(int(b["num_clips"]) for b in batch_data_list)
    row_tile = _pick_row_tile(n_rows, lane, C, t_bucket, target_block_bytes)

    for batch in batch_data_list:
        fi = np.asarray(batch["frame_indices"]).astype(np.int32).reshape(-1)
        T = int(fi.shape[0])
        if T < t_bucket:
            fi = np.concatenate([fi, np.zeros((t_bucket - T,), np.int32)])
        frame_idx = jnp.asarray(fi, dtype=jnp.int32)
        frames = _gather_permute_nchw(
            packed, frame_idx, channels=C, shifts=shifts, row_tile=row_tile)
        inputs = frames[:T].reshape(
            batch["num_clips"], clip_len, C, H, W)            # free view, as in torch
        yield {
            "inputs": inputs,
            "meta": {
                **misc_meta,
                "batch_id": batch["batch_id"],
                "num_clips": batch["num_clips"],
                "original_frame_shape": (H, W),
                "frame_shape": (H, W),
                "total_frames": T,
            },
        }


if __name__ == "__main__":
    key = jax.random.PRNGKey(0)
    keys = jax.random.split(key, 7)
    k_vid, k_idx0, k_idx1, k_vid2, k_idx2, k_vid3, k_idx3 = keys

    def _run_case(video, batch_data, clip_len, misc_meta, **kw):
        H, W, C = video.shape[1:]
        results = list(batch_decode_iter(video, batch_data, clip_len, misc_meta, **kw))
        for batch, res in zip(batch_data, results):
            idx = jnp.asarray(batch["frame_indices"], dtype=jnp.int32)
            ref = jnp.transpose(video[idx], (0, 3, 1, 2)).reshape(
                batch["num_clips"], clip_len, C, H, W)
            got = jax.block_until_ready(res["inputs"])
            assert got.dtype == jnp.uint8 and got.shape == ref.shape
            assert bool(jnp.array_equal(got, ref))
            assert res["meta"]["batch_id"] == batch["batch_id"]
            assert res["meta"]["frame_shape"] == (H, W)
            assert res["meta"]["original_frame_shape"] == (H, W)
            assert res["meta"]["total_frames"] == batch["num_clips"] * clip_len
            assert res["meta"]["num_clips"] == batch["num_clips"]
            for k, v in misc_meta.items():
                assert res["meta"][k] == v

    # Case 1: small square frames (lane-dense flatten, whole frame per block),
    # two batches of different size (exercises the T-bucket pad + slice path).
    F, H, W, C = 32, 16, 16, 4
    clip_len = 4
    video = jax.random.randint(
        k_vid, (F, H, W, C), 0, 256, dtype=jnp.int32).astype(jnp.uint8)
    batch_data = [
        {"batch_id": 0, "num_clips": 2,
         "frame_indices": np.asarray(jax.random.randint(k_idx0, (2 * clip_len,), 0, F))},
        {"batch_id": 1, "num_clips": 3,
         "frame_indices": np.asarray(jax.random.randint(k_idx1, (3 * clip_len,), 0, F))},
    ]
    _run_case(video, batch_data, clip_len, {"clip_len": clip_len, "fps": 30.0})

    # Case 2: W not a multiple of 128 but H*W = 128*37 -> lane-dense flatten
    # (lane=128, n_rows=37); tiny block target forces row_tile=32 and a ragged
    # last row block (32 + 5).
    F2, H2, W2 = 8, 64, 74
    clip2 = 2
    video2 = jax.random.randint(
        k_vid2, (F2, H2, W2, C), 0, 256, dtype=jnp.int32).astype(jnp.uint8)
    batch_data2 = [{"batch_id": 0, "num_clips": 2,
                    "frame_indices": np.asarray(
                        jax.random.randint(k_idx2, (2 * clip2,), 0, F2))}]
    _run_case(video2, batch_data2, clip2, {}, target_block_bytes=4096)

    # Case 3: H*W has no 128-multiple divisor -> fallback W-lane layout with
    # masked partial lane stores and a ragged row edge (56 = 32 + 24).
    F3, H3, W3 = 8, 56, 56
    clip3 = 2
    video3 = jax.random.randint(
        k_vid3, (F3, H3, W3, C), 0, 256, dtype=jnp.int32).astype(jnp.uint8)
    batch_data3 = [{"batch_id": 0, "num_clips": 2,
                    "frame_indices": np.asarray(
                        jax.random.randint(k_idx3, (2 * clip3,), 0, F3))}]
    _run_case(video3, batch_data3, clip3, {}, target_block_bytes=4096)

    print("KERNEL_OK")
</pallas_src>

<mosaic_0001>
module attributes {stable_mosaic.version = 11 : i64} {
  func.func @kernel(%arg0: i32, %arg1: i32, %arg2: memref<12xi32, #tpu.memory_space<smem>>, %arg3: memref<1x1x256xi32, #tpu.memory_space<vmem>>, %arg4: memref<1x4x1x256xi8, #tpu.memory_space<vmem>>) attributes {dimension_semantics = [#tpu.dimension_semantics<parallel>, #tpu.dimension_semantics<parallel>], iteration_bounds = array<i64: 12, 1>, scalar_prefetch = 1 : i64, scratch_operands = 0 : i64, tpu.core_type = #tpu.core_type<tc>, window_params = [{transform_indices = @transform_0, window_bounds = array<i64: 1, 1, 256>}, {transform_indices = @transform_1, window_bounds = array<i64: 1, 4, 1, 256>}]} {
    %c0 = arith.constant 0 : index
    %c0_0 = arith.constant 0 : index
    %c0_1 = arith.constant 0 : index
    %0 = vector.load %arg3[%c0, %c0_0, %c0_1] : memref<1x1x256xi32, #tpu.memory_space<vmem>>, vector<1x1x256xi32>
    %1 = vector.shape_cast %0 : vector<1x1x256xi32> to vector<1x256xi32>
    %2 = arith.trunci %1 : vector<1x256xi32> to vector<1x256xi8>
    %c0_2 = arith.constant 0 : index
    %c0_3 = arith.constant 0 : index
    %c0_4 = arith.constant 0 : index
    %c0_5 = arith.constant 0 : index
    %3 = vector.load %arg4[%c0_2, %c0_3, %c0_4, %c0_5] : memref<1x4x1x256xi8, #tpu.memory_space<vmem>>, vector<1x1x1x256xi8>
    %4 = vector.shape_cast %3 : vector<1x1x1x256xi8> to vector<1x256xi8>
    %5 = vector.shape_cast %2 : vector<1x256xi8> to vector<1x1x1x256xi8>
    tpu.vector_store %arg4[%c0_2, %c0_3, %c0_4, %c0_5], %5 {strides = array<i32>} : memref<1x4x1x256xi8, #tpu.memory_space<vmem>>, vector<1x1x1x256xi8>,
    %c8_i32 = arith.constant 8 : i32
    %6 = vector.broadcast %c8_i32 : i32 to vector<1x256xi32>
    %7 = arith.shrui %1, %6 : vector<1x256xi32>
    %8 = arith.trunci %7 : vector<1x256xi32> to vector<1x256xi8>
    %c0_6 = arith.constant 0 : index
    %c1 = arith.constant 1 : index
    %c0_7 = arith.constant 0 : index
    %c0_8 = arith.constant 0 : index
    %9 = vector.load %arg4[%c0_6, %c1, %c0_7, %c0_8] : memref<1x4x1x256xi8, #tpu.memory_space<vmem>>, vector<1x1x1x256xi8>
    %10 = vector.shape_cast %9 : vector<1x1x1x256xi8> to vector<1x256xi8>
    %11 = vector.shape_cast %8 : vector<1x256xi8> to vector<1x1x1x256xi8>
    tpu.vector_store %arg4[%c0_6, %c1, %c0_7, %c0_8], %11 {strides = array<i32>} : memref<1x4x1x256xi8, #tpu.memory_space<vmem>>, vector<1x1x1x256xi8>,
    %c16_i32 = arith.constant 16 : i32
    %12 = vector.broadcast %c16_i32 : i32 to vector<1x256xi32>
    %13 = arith.shrui %1, %12 : vector<1x256xi32>
    %14 = arith.trunci %13 : vector<1x256xi32> to vector<1x256xi8>
    %c0_9 = arith.constant 0 : index
    %c2 = arith.constant 2 : index
    %c0_10 = arith.constant 0 : index
    %c0_11 = arith.constant 0 : index
    %15 = vector.load %arg4[%c0_9, %c2, %c0_10, %c0_11] : memref<1x4x1x256xi8, #tpu.memory_space<vmem>>, vector<1x1x1x256xi8>
    %16 = vector.shape_cast %15 : vector<1x1x1x256xi8> to vector<1x256xi8>
    %17 = vector.shape_cast %14 : vector<1x256xi8> to vector<1x1x1x256xi8>
    tpu.vector_store %arg4[%c0_9, %c2, %c0_10, %c0_11], %17 {strides = array<i32>} : memref<1x4x1x256xi8, #tpu.memory_space<vmem>>, vector<1x1x1x256xi8>,
    %c24_i32 = arith.constant 24 : i32
    %18 = vector.broadcast %c24_i32 : i32 to vector<1x256xi32>
    %19 = arith.shrui %1, %18 : vector<1x256xi32>
    %20 = arith.trunci %19 : vector<1x256xi32> to vector<1x256xi8>
    %c0_12 = arith.constant 0 : index
    %c3 = arith.constant 3 : index
    %c0_13 = arith.constant 0 : index
    %c0_14 = arith.constant 0 : index
    %21 = vector.load %arg4[%c0_12, %c3, %c0_13, %c0_14] : memref<1x4x1x256xi8, #tpu.memory_space<vmem>>, vector<1x1x1x256xi8>
    %22 = vector.shape_cast %21 : vector<1x1x1x256xi8> to vector<1x256xi8>
    %23 = vector.shape_cast %20 : vector<1x256xi8> to vector<1x1x1x256xi8>
    tpu.vector_store %arg4[%c0_12, %c3, %c0_13, %c0_14], %23 {strides = array<i32>} : memref<1x4x1x256xi8, #tpu.memory_space<vmem>>, vector<1x1x1x256xi8>,
    return
  }
  func.func @transform_0(%arg0: i32, %arg1: i32, %arg2: memref<12xi32, #tpu.memory_space<smem>>) -> (i32, i32, i32) {
    %0 = arith.index_cast %arg0 : i32 to index
    %1 = memref.load %arg2[%0] : memref<12xi32, #tpu.memory_space<smem>>
    %c0_i32 = arith.constant 0 : i32
    %c0_i32_0 = arith.constant 0 : i32
    return %1, %arg1, %c0_i32 : i32, i32, i32
  }
  func.func @transform_1(%arg0: i32, %arg1: i32, %arg2: memref<12xi32, #tpu.memory_space<smem>>) -> (i32, i32, i32, i32) {
    %c0_i32 = arith.constant 0 : i32
    %c0_i32_0 = arith.constant 0 : i32
    %c0_i32_1 = arith.constant 0 : i32
    return %arg0, %c0_i32, %arg1, %c0_i32_0 : i32, i32, i32, i32
  }
}

</mosaic_0001>

<bundles_post_ra>
// kernel: _gather_permute_nchw.1
= control target key start
LH: loop header
LB: loop body
LE: loop exit
PB: predicated region body
PF: predicated region fallthrough
CT: control target
= control target key end

     0   :  { %s508_s12 = smov [#allocation3]   ;;  %s662_s0 = inlined_call_operand.hbm [shape: s32[12], index: 0, kind: input, shape index: {}]   ;;  %s663_s1 = inlined_call_operand.hbm [shape: u32[32,1,256], index: 1, kind: input, shape index: {}]   ;;  %s664_s2 = inlined_call_operand.vmem [shape: u8[12,4,1,256], index: 2, kind: output, shape index: {}]  }
   0x1   :  { %s8_s11 = sshll.u32 %s662_s0, 4  ;;  %s9_s11 = int_to_ptr.hbm [resolvable:$true] %s8_s11 }
   0x2   :  { %11 = dma.hbm_to_smem %s9_s11, 16, %s508_s12, [#allocation2] }
   0x3   :  { %478 = dma.done.wait [#allocation2], 16 }
   0x4   :  { %479 = vsyncadd [#allocation2], 4294967280 }
   0x5   :  { %14 = sfence }
   0x6   :  { %15 = vsyncpa [#allocation5], 0 }
   0x7   :  { %17 = vsyncpa [#allocation5 + $0x1], 0  ;;  %s527_s13 = smov 0   ;;  %s529_s14 = smov 0  }
   0x8   :  { %s531_s15 = smov 0   ;;  %s533_s16 = smov 0  }
   0x9   :  { %s535_s17 = smov 0   ;;  %s537_s18 = smov 0  }
   0xa LB: > { %s35_s0 = sadd.s32 1, %s502_s17  ;;  %s335_s19 = sadd.s32 4294967295, %s506_s18   ;;  %s506_s18 = sphi %s537_s18, %s23_s18   ;;  %s502_s17 = sphi %s535_s17, %s676_s17   ;;  %s498_s16 = sphi %s533_s16, %s675_s16   ;;  %s494_s15 = sphi %s531_s15, %s674_s15   ;;  %s490_s14 = sphi %s529_s14, %s673_s14   ;;  %s486_s13 = sphi %s527_s13, %s672_s13  }
   0xb   : > { %p37_p0 = scmp.ge.s32.totalorder %s35_s0, 12  ;;  %s39_s20 = sld [smem:[#allocation3 + %s502_s17]] }
   0xc   : > { %p53_p1 = scmp.ne.s32.totalorder %s494_s15, %s490_s14  ;;  %p54_p2 = scmp.eq.s32.totalorder %s506_s18, 0 }
   0xd   : > { %s678_s0 = smov (%p37_p0, %s35_s0), 0  ;;  %p59_p3 = scmp.ne.s32.totalorder %s490_s14, %s486_s13 }
   0xe   : > { %s40_s21 = sld [smem:[#allocation3 + %s678_s0]]  ;;  %p60_p4 = scmp.eq.s32.totalorder %s335_s19, 0 }
   0xf   : > { %s111_s23 = sand.u32 1, %s494_s15   ;;  %s46_s24 = sadd.s32 1, %s494_s15 }
  0x10   : > { %p565_p5 = por %p60_p4, %p59_p3  ;;  %p55_p6 = por %p54_p2, %p53_p1 }
  0x11   : > { %p362_p7 = scmp.lt.s32.totalorder %s506_s18, 12  ;;  %p341_p8 = scmp.ge.s32.totalorder %s506_s18, 1 }
  0x12   : > { %s339_s26 = sshll.u32 %s111_s23, 1  ;;  %p131_p11 = scmp.lt.s32.totalorder %s506_s18, 13 }
  0x13   : > { %p573_p10 = pnand %p362_p7, %p55_p6  ;;  %s115_s5 = scalar_lea.vmem [#allocation4], %s339_s26 }
  0x14   : > { %s41_s25 = ssub.s32 %s39_s20, %s40_s21  ;;  %p582_p12 = pnand %p341_p8, %p131_p11 }
  0x15   : > { %p44_p9 = scmp.eq.s32.totalorder %s41_s25, 0  ;;  %s126_s6 = sshll.u32 %s115_s5, 4  ;;  %s127_s6 = int_to_ptr.vmem [resolvable:$true] %s126_s6 }
  0x16   : > { %s352_s28 = scalar_select %p55_p6, [#allocation3], [#allocation6] }
  0x17   : > { %s578_s29 = scalar_select %p44_p9, %s494_s15, %s46_s24  }
  0x18   : > { %s353_s30 = scalar_select %p55_p6, %s502_s17, 0 }
  0x19   : > { %s680_s28 = smov (!%p362_p7, %s352_s28), [#allocation7]  ;;  %s112_s12 = scalar_lea.sflag [#allocation5], %s111_s23 }
  0x1a   : > { %s682_s30 = smov (!%p362_p7, %s353_s30), 0  ;;  %p428_p0 = pneg %p573_p10 }
  0x1b   : > { %s116_s3 = sld [smem:[%s680_s28 + %s682_s30]]  ;;  %s431_s24 = scalar_lea.hbm %s663_s1, 64 }
  0x21   : > { %s340_s7 = sshll.u32 %s116_s3, 1 }
  0x22   : > { %s122_s10 = scalar_lea.hbm %s663_s1, %s340_s7 }
  0x23   : > { %s124_s11 = sshll.u32 %s122_s10, 4  ;;  %s125_s11 = int_to_ptr.hbm [resolvable:$true] %s124_s11 }
  0x24   : > { %s424_s13 = sshra.s32 %s125_s11, 4  ;;  %s425_s13 = int_to_ptr.hbm [resolvable:$true] %s424_s13 }
  0x25   : > { %s426_s19 = scalar_lea.hbm %s425_s13, 2  ;;  %p432_p3 = scmp.lt.s32.totalorder %s425_s13, %s663_s1 }
  0x26   : > { %p427_p13 = scmp.ne.s32.totalorder %s425_s13, %s426_s19  ;;  %p433_p4 = scmp.lt.s32.totalorder %s431_s24, %s426_s19 }
  0x28   : > { %p429_p1 = pnand %p428_p0, %p427_p13  ;;  %p434_p6 = por %p433_p4, %p432_p3 }
  0x2a   : > { %p430_p2 = pneg %p429_p1 }
  0x2c   : > { %p435_p7 = pnand %p434_p6, %p430_p2 }
  0x2e   : > { %438 = shalt.err (!%p435_p7)
}
  0x2f   : > { %361 = dma.hbm_to_vmem [thread:$0]  (!%p573_p10), %s125_s11, 32, %s127_s6, %s112_s12  }
  0x30   : > { %135 = sbr.rel (%p582_p12) target bundleno = 71 (0x47), region = 24  ;;  %s137_s23 = sand.u32 (!%p582_p12), 1, %s490_s14  }
  0x31   : > { %s342_s28 = sshll.u32 (!%p582_p12), %s137_s23, 1  ;;  %s138_s30 = scalar_lea.sflag (!%p582_p12), [#allocation5], %s137_s23 }
  0x32   : > { %s141_s3 = scalar_lea.vmem (!%p582_p12), [#allocation4], %s342_s28 }
  0x35   : > { %481 = dma.done.wait (%p565_p5), %s138_s30, 32  }
  0x36   : > { %483 = vsyncadd (%p565_p5), %s138_s30, 4294967264  ;;  %p165_p8 = scmp.lt.s32.totalorder %s498_s16, 11  ;;  %vm187_vm0 = vsmask.f32 0  ;;  %v173_v0 = vld [vmem:[%s141_s3] sm:$0x3] }
  0x37   : > { %vm181_vm1 = vcmask 1040384   ;;  %vm189_vm2 = vcmask 1041409   ;;  %vm190_vm3 = vsmask.f32 1024  ;;  %v174_v1 = vperm.slane %v173_v0, 0 }
  0x38   : > { %s684_s16 = smov (!%p165_p8, %s498_s16), 11  ;;  %v175_v2 = vperm.slane %v173_v0, 1  ;;  %v196_v3 = vshrl.u32 %v173_v0, 8  ;;  %v212_v4 = vshrl.u32 %v173_v0, 16  ;;  %v228_v5 = vshrl.u32 %v173_v0, 24  ;;  %vm609_vm4 = vmand %vm181_vm1, %vm187_vm0 }
  0x39   : > { %s343_s27 = sshll.u32 %s684_s16, 3  ;;  %v176_v6 = vpack.c.b16 %v174_v1, %v174_v1  ;;  %vm191_vm5 = vmand %vm189_vm2, %vm190_vm3 }
  0x3a   : > { %v178_v7 = vpack.c.b16 %v175_v2, %v175_v2  ;;  %v197_v9 = vperm.slane %v196_v3, 0  ;;  %v198_v10 = vperm.slane %v196_v3, 1  ;;  %s616_s5 = scalar_lea.vmem %s664_s2, %s343_s27  ;;  %v213_v11 = vperm.slane %v212_v4, 0  ;;  %vm620_vm6 = vmor %vm191_vm5, %vm609_vm4 }
  0x3b   : > { %v214_v12 = vperm.slane %v212_v4, 1  ;;  %v229_v13 = vperm.slane %v228_v5, 0  ;;  %v230_v14 = vperm.slane %v228_v5, 1  ;;  %v177_v15 = vpack.c.b8 %v176_v6, %v176_v6  ;;  %v193_v25 = vld [vmem:[%s616_s5] sm:$0x3] }
  0x3c   : > { %v179_v16 = vpack.c.b8 %v178_v7, %v178_v7  ;;  %v199_v17 = vpack.c.b16 %v197_v9, %v197_v9  ;;  %v201_v18 = vpack.c.b16 %v198_v10, %v198_v10  ;;  %v215_v19 = vpack.c.b16 %v213_v11, %v213_v11  ;;  %v344_v34 = vld [vmem:[%s616_s5 + $0x2] sm:$0x3]  ;;  %v346_v37 = vld [vmem:[%s616_s5 + $0x4] sm:$0x3]  ;;  %v348_v39 = vld [vmem:[%s616_s5 + $0x6] sm:$0x3] }
  0x3d   : > { %v217_v20 = vpack.c.b16 %v214_v12, %v214_v12  ;;  %v231_v21 = vpack.c.b16 %v229_v13, %v229_v13  ;;  %v233_v22 = vpack.c.b16 %v230_v14, %v230_v14 }
  0x3e   : > { %v180_v23 = vrot.slane %v179_v16, 7  ;;  %v200_v26 = vpack.c.b8 %v199_v17, %v199_v17  ;;  %v202_v27 = vpack.c.b8 %v201_v18, %v201_v18  ;;  %v216_v28 = vpack.c.b8 %v215_v19, %v215_v19 }
  0x3f   : > { %v218_v29 = vpack.c.b8 %v217_v20, %v217_v20  ;;  %v232_v30 = vpack.c.b8 %v231_v21, %v231_v21  ;;  %v234_v31 = vpack.c.b8 %v233_v22, %v233_v22 }
  0x40   : > { %v184_v32 = vsel %vm181_vm1, %v177_v15, %v180_v23  ;;  %v203_v33 = vrot.slane %v202_v27, 7 }
  0x41   : > { %v194_v35 = vsel %vm620_vm6, %v184_v32, %v193_v25  ;;  %v219_v36 = vrot.slane %v218_v29, 7  ;;  %v235_v38 = vrot.slane %v234_v31, 7 }
  0x42   : > { %195 = vst [vmem:[%s616_s5] sm:$0x3] %v194_v35  ;;  %v206_v40 = vsel %vm181_vm1, %v200_v26, %v203_v33 }
  0x43   : > { %v210_v41 = vsel %vm620_vm6, %v206_v40, %v344_v34  ;;  %v222_v42 = vsel %vm181_vm1, %v216_v28, %v219_v36  ;;  %v238_v43 = vsel %vm181_vm1, %v232_v30, %v235_v38 }
  0x44   : > { %345 = vst [vmem:[%s616_s5 + $0x2] sm:$0x3] %v210_v41  ;;  %v226_v44 = vsel %vm620_vm6, %v222_v42, %v346_v37  ;;  %v242_v45 = vsel %vm620_vm6, %v238_v43, %v348_v39 }
  0x45   : > { %347 = vst [vmem:[%s616_s5 + $0x4] sm:$0x3] %v226_v44 }
  0x46   : > { %349 = vst [vmem:[%s616_s5 + $0x6] sm:$0x3] %v242_v45 }
  0x47 PF: > { %s23_s18 = sadd.s32 1, %s506_s18   ;;  %s672_s13 = smov %s490_s14 }
  0x48   : > { %p20_p5 = scmp.ge.s32.totalorder %s23_s18, 14   ;;  %s673_s14 = smov %s494_s15 }
  0x49   : > { %s674_s15 = smov %s578_s29  ;;  %s675_s16 = smov %s502_s17 }
  0x4a   : > { %s676_s17 = smov %s678_s0  ;;  %22 = sbr.rel (!%p20_p5) target bundleno = 10 (0xa), region = 67 }
  0x4f   :  { %271 = vsyncpa [#allocation5], 1 }
  0x50   :  { %273 = vsyncpa [#allocation5 + $0x1], 1 }

</bundles_post_ra>
